<compile_context>
chip_gen: v5e
topology: v5e:2x2
jax: 0.10.0
libtpu: 0.0.40
codegen_flags: <defaults>
</compile_context>

<pallas_src>
import functools

import jax
import jax.numpy as jnp
from jax.experimental import pallas as pl
from jax.experimental.pallas import tpu as pltpu

_LANES = 128
_MIN_GRID = 4  # keep >= 4 grid steps when possible (pipelining + v7x 2-TC split)


def _round_up(v, m):
    return ((v + m - 1) // m) * m


def _softargmax1d_kernel(x_ref, o_ref, *, base_index, step_size, beta):
    # x_ref block: (2, TILE_N); o_ref block: (1, TILE_N). Pure elementwise.
    x0 = x_ref[0:1, :].astype(jnp.float32)
    x1 = x_ref[1:2, :].astype(jnp.float32)
    d = (x1 - x0) * beta
    # softmax([b0, b1])[1] == sigmoid(b1 - b0); inf-safe in f32.
    # exp and the approximate reciprocal both run on the EUP slot.
    p1 = pl.reciprocal(1.0 + jnp.exp(-d), approx=True)
    # indices = [base, base + step]  =>  out = base + step * p1  (p0 + p1 = 1).
    o_ref[...] = (base_index + step_size * p1).astype(o_ref.dtype)


def soft_argmax_1d(x, base_index=0, step_size=1, beta=2,
                   tile_frames=131072, min_pallas_frames=16384):
    """Pallas SoftArgmax1D.forward. x: (2, N) -> (N,) float32."""
    D, N = x.shape
    if D != 2:
        raise ValueError("SoftArgmax1D kernel specialises the [2, n_frames] input")

    if N < min_pallas_frames:
        # Tiny problem: a fused XLA elementwise expression beats the fixed cost
        # of a pallas_call launch for a memory-bound one-liner.
        d = (x[1].astype(jnp.float32) - x[0].astype(jnp.float32)) * float(beta)
        return float(base_index) + float(step_size) * jax.nn.sigmoid(d)

    # Tile the frame axis of the original (2, N) array directly: no pad, no
    # relayout, no trailing slice.  Tile is a multiple of 128 lanes and capped
    # so the grid has >= _MIN_GRID steps whenever N allows it; Pallas masks the
    # partial last block's output writes.
    tn = max(_LANES, min(int(tile_frames),
                         _round_up(pl.cdiv(N, _MIN_GRID), _LANES)))
    grid = pl.cdiv(N, tn)

    kernel = functools.partial(
        _softargmax1d_kernel,
        base_index=float(base_index),   # folded as f32 constants
        step_size=float(step_size),
        beta=float(beta),
    )

    out = pl.pallas_call(
        kernel,
        out_shape=jax.ShapeDtypeStruct((1, N), jnp.float32),
        grid=(grid,),
        in_specs=[pl.BlockSpec((2, tn), lambda i: (0, i))],
        out_specs=pl.BlockSpec((1, tn), lambda i: (0, i)),
        compiler_params=pltpu.CompilerParams(
            dimension_semantics=("parallel",)),
    )(x)
    # (1, N) -> (N,) is a free, layout-preserving reshape (no HBM copy).
    return out.reshape(N)


def _reference(x, base_index=0, step_size=1, beta=2):
    x_sparse = x.astype(jnp.float32) * beta
    smax = jax.nn.softmax(x_sparse, axis=0)
    indices = base_index + step_size * jnp.arange(x.shape[0], dtype=jnp.float32)
    return smax.T @ indices


if __name__ == "__main__":
    key = jax.random.PRNGKey(0)
    k1, k2 = jax.random.split(key)

    # TODO(synk): the PyTorch forward also does `print(torch.bernoulli(smax))`
    # — a host-side debug print with no effect on the returned value; omitted
    # so stdout is exactly "KERNEL_OK".

    # Small shape from the module spec ([2, n_frames]); force the Pallas path
    # and use a non-multiple-of-128 frame count to exercise the
    # partial-last-block masking (tile=256, grid=4).
    n_small = 1000
    x_small = jax.random.normal(k1, (2, n_small), dtype=jnp.float32)
    out_small = jax.block_until_ready(
        soft_argmax_1d(x_small, base_index=0, step_size=1, beta=2,
                       min_pallas_frames=0))

    # Moderate case through the default path (multi-block grid=4, partial tail).
    n_big = 40000
    x_big = jax.random.normal(k2, (2, n_big), dtype=jnp.float32)
    out_big = jax.block_until_ready(
        soft_argmax_1d(x_big, base_index=0, step_size=1, beta=2))

    ref_small = _reference(x_small, base_index=0, step_size=1, beta=2)
    ref_big = _reference(x_big, base_index=0, step_size=1, beta=2)

    assert out_small.shape == (n_small,), out_small.shape
    assert out_big.shape == (n_big,), out_big.shape
    # Tolerance accounts for the EUP approximate reciprocal (still far tighter
    # than any real bug: outputs live in [0, 1]).
    assert jnp.allclose(out_small, ref_small, atol=5e-3, rtol=5e-3)
    assert jnp.allclose(out_big, ref_big, atol=5e-3, rtol=5e-3)
    print("KERNEL_OK")
</pallas_src>

<mosaic_0001>
module attributes {stable_mosaic.version = 11 : i64} {
  func.func @_softargmax1d_kernel(%arg0: i32, %arg1: memref<2x256xf32, #tpu.memory_space<vmem>>, %arg2: memref<1x256xf32, #tpu.memory_space<vmem>>) attributes {dimension_semantics = [#tpu.dimension_semantics<parallel>], iteration_bounds = array<i64: 4>, scalar_prefetch = 0 : i64, scratch_operands = 0 : i64, tpu.core_type = #tpu.core_type<tc>, window_params = [{transform_indices = @transform_0, window_bounds = array<i64: 2, 256>}, {transform_indices = @transform_1, window_bounds = array<i64: 1, 256>}]} {
    %c0 = arith.constant 0 : index
    %c0_0 = arith.constant 0 : index
    %0 = vector.load %arg1[%c0, %c0_0] : memref<2x256xf32, #tpu.memory_space<vmem>>, vector<1x256xf32>
    %c1 = arith.constant 1 : index
    %c0_1 = arith.constant 0 : index
    %1 = vector.load %arg1[%c1, %c0_1] : memref<2x256xf32, #tpu.memory_space<vmem>>, vector<1x256xf32>
    %2 = arith.subf %1, %0 : vector<1x256xf32>
    %cst = arith.constant 2.000000e+00 : f32
    %3 = vector.broadcast %cst : f32 to vector<1x256xf32>
    %4 = arith.mulf %2, %3 : vector<1x256xf32>
    %cst_2 = arith.constant 0.000000e+00 : f32
    %5 = vector.broadcast %cst_2 : f32 to vector<1x256xf32>
    %6 = arith.subf %5, %4 : vector<1x256xf32>
    %7 = math.exp %6 : vector<1x256xf32>
    %cst_3 = arith.constant 1.000000e+00 : f32
    %8 = vector.broadcast %cst_3 : f32 to vector<1x256xf32>
    %9 = arith.addf %8, %7 : vector<1x256xf32>
    %10 = tpu.reciprocal %9 {approx = true} : vector<1x256xf32> -> vector<1x256xf32>
    %cst_4 = arith.constant 1.000000e+00 : f32
    %11 = vector.broadcast %cst_4 : f32 to vector<1x256xf32>
    %12 = arith.mulf %11, %10 : vector<1x256xf32>
    %cst_5 = arith.constant 0.000000e+00 : f32
    %13 = vector.broadcast %cst_5 : f32 to vector<1x256xf32>
    %14 = arith.addf %13, %12 : vector<1x256xf32>
    %c0_6 = arith.constant 0 : index
    %c0_7 = arith.constant 0 : index
    %15 = vector.load %arg2[%c0_6, %c0_7] : memref<1x256xf32, #tpu.memory_space<vmem>>, vector<1x256xf32>
    tpu.vector_store %arg2[%c0_6, %c0_7], %14 {strides = array<i32>} : memref<1x256xf32, #tpu.memory_space<vmem>>, vector<1x256xf32>,
    return
  }
  func.func @transform_0(%arg0: i32) -> (i32, i32) {
    %c0_i32 = arith.constant 0 : i32
    %c0_i32_0 = arith.constant 0 : i32
    return %c0_i32, %arg0 : i32, i32
  }
  func.func @transform_1(%arg0: i32) -> (i32, i32) {
    %c0_i32 = arith.constant 0 : i32
    %c0_i32_0 = arith.constant 0 : i32
    return %c0_i32, %arg0 : i32, i32
  }
}

</mosaic_0001>

<bundles_post_ra>
// kernel: tpu_custom_call.1
= control target key start
LH: loop header
LB: loop body
LE: loop exit
PB: predicated region body
PF: predicated region fallthrough
CT: control target
= control target key end

     0   :  { %6 = vsyncpa [#allocation3], 0  ;;  %s538_s0 = inlined_call_operand.hbm [shape: f32[2,1000], index: 0, kind: input, shape index: {}]   ;;  %s539_s1 = inlined_call_operand.hbm [shape: f32[1,1000], index: 1, kind: output, shape index: {}]  }
   0x1   :  { %8 = vsyncpa [#allocation3 + $0x1], 0 }
   0x2   :  { %9 = vsyncpa [#allocation4], 0 }
   0x3   :  { %11 = vsyncpa [#allocation4 + $0x1], 0  ;;  %s412_s6 = smov 0   ;;  %s414_s7 = smov 0  }
   0x4   :  { %s416_s8 = smov 0   ;;  %s418_s9 = smov 0  }
   0x5 LB: > { %s433_s10 = sadd.s32 4294967295, %s400_s9   ;;  %s239_s11 = sadd.s32 4294967294, %s400_s9   ;;  %s400_s9 = sphi %s418_s9, %s548_s9   ;;  %s396_s8 = sphi %s416_s8, %s547_s8   ;;  %s392_s7 = sphi %s414_s7, %s546_s7   ;;  %s388_s6 = sphi %s412_s6, %s545_s6  }
   0x6   : > { %s437_s12 = sadd.s32 1, %s400_s9   ;;  %s24_s13 = sadd.s32 1, %s396_s8 }
   0x7   : > { %s21_s14 = ssub.s32 %s400_s9, %s437_s12  ;;  %p31_p0 = scmp.ne.s32.totalorder %s396_s8, %s392_s7 }
   0x8   : > { %p22_p1 = scmp.eq.s32.totalorder %s21_s14, 0  ;;  %p32_p2 = scmp.eq.s32.totalorder %s400_s9, 0 }
   0x9   : > { %p37_p3 = scmp.ne.s32.totalorder %s392_s7, %s388_s6  ;;  %p38_p4 = scmp.eq.s32.totalorder %s433_s10, 0 }
   0xa   : > { %s449_s15 = scalar_select %p22_p1, %s396_s8, %s24_s13  }
   0xb   : > { %p451_p5 = por %p32_p2, %p31_p0  ;;  %p455_p6 = por %p38_p4, %p37_p3 }
   0xc   : > { %p61_p7 = scmp.eq.s32.totalorder %s433_s10, 3  ;;  %p67_p8 = scmp.eq.s32.totalorder %s239_s11, 3 }
   0xd   : > { %p266_p9 = scmp.lt.s32.totalorder %s400_s9, 4  ;;  %s87_s20 = sand.u32 1, %s396_s8  }
   0xe   : > { %p461_p10 = por %p61_p7, %p31_p0  ;;  %p465_p11 = por %p67_p8, %p37_p3 }
   0xf   : > { %s253_s21 = sshll.u32 %s400_s9, 2  ;;  %s242_s22 = sshll.u32 %s87_s20, 2 }
  0x10   : > { %s96_s25 = scalar_lea.hbm %s538_s0, %s253_s21  ;;  %s91_s27 = scalar_lea.vmem [#allocation2], %s242_s22 }
  0x11   : > { %s98_s26 = sshll.u32 %s96_s25, 4  ;;  %s100_s28 = sshll.u32 %s91_s27, 4  ;;  %s99_s26 = int_to_ptr.hbm [resolvable:$true] %s98_s26  ;;  %s101_s28 = int_to_ptr.vmem [resolvable:$true] %s100_s28 }
  0x12   : > { %p476_p12 = pnand %p266_p9, %p451_p5  ;;  %p245_p13 = scmp.ge.s32.totalorder %s400_s9, 1 }
  0x13   : > { %p105_p0 = scmp.lt.s32.totalorder %s400_s9, 5  ;;  %s88_s30 = scalar_lea.sflag [#allocation3], %s87_s20 }
  0x14   : > { %s304_s2 = sshra.s32 %s99_s26, 4  ;;  %p308_p2 = pneg %p476_p12  ;;  %s305_s2 = int_to_ptr.hbm [resolvable:$true] %s304_s2 }
  0x15   : > { %s306_s3 = scalar_lea.hbm %s305_s2, 4  ;;  %s311_s11 = scalar_lea.hbm %s538_s0, 16 }
  0x16   : > { %p307_p1 = scmp.ne.s32.totalorder %s305_s2, %s306_s3  ;;  %p312_p5 = scmp.lt.s32.totalorder %s305_s2, %s538_s0 }
  0x17   : > { %p313_p7 = scmp.lt.s32.totalorder %s311_s11, %s306_s3 }
  0x18   : > { %p309_p3 = pnand %p308_p2, %p307_p1 }
  0x19   : > { %p314_p8 = por %p313_p7, %p312_p5 }
  0x1a   : > { %p310_p4 = pneg %p309_p3 }
  0x1c   : > { %p315_p9 = pnand %p314_p8, %p310_p4 }
  0x1e   : > { %318 = shalt.err (!%p315_p9)
}
  0x1f   : > { %261 = dma.hbm_to_vmem [thread:$0]  (!%p476_p12), %s99_s26, 64, %s101_s28, %s88_s30  }
  0x20   : > { %p106_p1 = pnand %p245_p13, %p105_p0 }
  0x21   : > { %s497_s16 = sand.u32 (!%p106_p1), 1, %s392_s7  }
  0x22   : > { %109 = sbr.rel (%p106_p1) target bundleno = 69 (0x45), region = 24  ;;  %s246_s20 = sshll.u32 (!%p106_p1), %s497_s16, 2 }
  0x23   : > { %s112_s21 = scalar_lea.sflag (!%p106_p1), [#allocation3], %s497_s16  ;;  %s115_s22 = scalar_lea.vmem (!%p106_p1), [#allocation2], %s246_s20 }
  0x27   : > { %379 = dma.done.wait (%p455_p6), %s112_s21, 64  }
  0x28   : > { %381 = vsyncadd (%p455_p6), %s112_s21, 4294967232  ;;  %v137_v0 = vld [vmem:[%s115_s22] ss:$2 sm:$0x3]  ;;  %s247_s23 = sshll.u32 %s497_s16, 1  ;;  %s250_s24 = sshll.u32 %s433_s10, 1  ;;  %v148_v8 = vlaneseq }
  0x29   : > { %v248_v1 = vld [vmem:[%s115_s22 + $0x1] ss:$2 sm:$0x3]  ;;  %s164_s27 = scalar_lea.hbm %s539_s1, %s250_s24  ;;  %s134_s17 = scalar_lea.vmem [#allocation5], %s247_s23 }
  0x2a   : > { %v140_v2 = vsub.f32 %v248_v1, %v137_v0  ;;  %s166_s28 = sshll.u32 %s134_s17, 4  ;;  %s168_s29 = sshll.u32 %s164_s27, 4  ;;  %vm150_vm0 = vcmp.lt.s32.totalorder %v148_v8, 256  ;;  %s167_s28 = int_to_ptr.vmem [resolvable:$true] %s166_s28  ;;  %s169_s29 = int_to_ptr.hbm [resolvable:$true] %s168_s29 }
  0x2b   : > { %s154_s30 = scalar_lea.sflag [#allocation4], %s497_s16  ;;  %s348_s2 = sshra.s32 %s169_s29, 4  ;;  %s349_s2 = int_to_ptr.hbm [resolvable:$true] %s348_s2 }
  0x2c   : > { %v141_v3 = vmul.f32 2.0, %v140_v2  ;;  %s350_s10 = scalar_lea.hbm %s349_s2, 2  ;;  %s354_s5 = scalar_lea.hbm %s539_s1, 8 }
  0x2d   : > { %p351_p6 = scmp.ne.s32.totalorder %s349_s2, %s350_s10  ;;  %p355_p0 = scmp.lt.s32.totalorder %s349_s2, %s539_s1 }
  0x2e   : > { %v142_v4 = vsub.f32 0.0, %v141_v3  ;;  %p356_p2 = scmp.lt.s32.totalorder %s354_s5, %s350_s10 }
  0x2f   : > { %p352_p12 = pnand %p351_p6, %p461_p10 }
  0x30   : > { %v143_v5 = vmul.f32 1.442695, %v142_v4  ;;  %p357_p3 = por %p356_p2, %p355_p0 }
  0x31   : > { %p353_p13 = pneg %p352_p12 }
  0x32   : > { %300 = vpow2.f32 %v143_v5 }
  0x33   : > { %p358_p4 = pnand %p357_p3, %p353_p13 }
  0x38   : > { %v301_v6 = vpop.eup %300 }
  0x39   : > { %v145_v7 = vadd.f32 1.0, %v301_v6 }
  0x3b   : > { %302 = vrcp.f32 %v145_v7 }
  0x41   : > { %v303_v9 = vpop.eup %302 }
  0x42   : > { %152 = vst.msk [vmem:[%s134_s17] sm:$0x3] %vm150_vm0, %v303_v9 }
  0x43   : > { %361 = shalt.err (!%p358_p4)
}
  0x44   : > { %256 = dma.vmem_to_hbm [thread:$0]  (%p461_p10), %s167_s28, 32, %s169_s29, %s154_s30  }
  0x45 PF: > { %p267_p5 = scmp.ge.s32.totalorder %s400_s9, 2  ;;  %s180_s14 = sand.u32 1, %s388_s6  }
  0x46   : > { %s181_s16 = scalar_lea.sflag [#allocation4], %s180_s14 }
  0x47   : > { %p263_p7 = pnand %p267_p5, %p465_p11 }
  0x49   : > { %p264_p8 = pneg %p263_p7 }
  0x4b   : > { %383 = dma.done.wait (%p264_p8), %s181_s16, 32  }
  0x4c   : > { %385 = vsyncadd (%p264_p8), %s181_s16, 4294967264  ;;  %p14_p9 = scmp.ge.s32.totalorder %s437_s12, 6   ;;  %s545_s6 = smov %s392_s7 }
  0x4d   : > { %s546_s7 = smov %s396_s8  ;;  %s547_s8 = smov %s449_s15 }
  0x4e   : > { %s548_s9 = smov %s437_s12  ;;  %16 = sbr.rel (!%p14_p9) target bundleno = 5 (0x5), region = 70 }
  0x53   :  { %187 = vsyncpa [#allocation3], 1 }
  0x54   :  { %189 = vsyncpa [#allocation3 + $0x1], 1 }
  0x55   :  { %190 = vsyncpa [#allocation4], 1 }
  0x56   :  { %192 = vsyncpa [#allocation4 + $0x1], 1 }

</bundles_post_ra>
